<compile_context>
chip_gen: v7x
topology: tpu7x:2x2x1
jax: 0.10.0
libtpu: 0.0.40
codegen_flags: <defaults>
</compile_context>

<pallas_src>
import functools

import jax
import jax.numpy as jnp
from jax.experimental import pallas as pl
from jax.experimental.pallas import tpu as pltpu


def _round_up(x, m):
    return ((x + m - 1) // m) * m


def resolve_elementwise_dtype(matmul_dtype, elementwise_dtype=None):
    """bf16 bias/ReLU on chips with a bf16 VPU (v6e/v7x), f32 otherwise."""
    if elementwise_dtype is not None:
        return jnp.dtype(elementwise_dtype)
    if jnp.dtype(matmul_dtype) == jnp.dtype(jnp.float32):
        return jnp.dtype(jnp.float32)
    try:
        kind = jax.devices()[0].device_kind.lower()
    except Exception:
        kind = ""
    if any(tag in kind for tag in ("v2", "v3", "v4", "v5")):
        return jnp.dtype(jnp.float32)       # no bf16 VALU on these chips
    return jnp.dtype(matmul_dtype)


def mlp_kernel(x_ref, w1_ref, b1_ref, w2_ref, b2_ref, w3_ref, b3_ref, o_ref,
               *, matmul_dtype, ew_dtype, chunk):
    """One batch tile.  x_ref: (T, 6) f32; o_ref: (4, T) f32 lane-dense."""
    tile = x_ref.shape[0]
    num_chunks = tile // chunk
    # Static unrolled loop over sub-chunks keeps h1/h2 register-resident.
    for c in range(num_chunks):
        start = c * chunk
        xc = x_ref[pl.ds(start, chunk), :]                     # (C, 6) f32
        xt = xc.T.astype(matmul_dtype)                         # (6, C) feature-major

        # layer 1: (16,6) @ (6,C) -> f32 accumulate; bias+ReLU in ew_dtype
        a1 = jnp.dot(w1_ref[...], xt, preferred_element_type=jnp.float32)
        h1 = jnp.maximum(a1.astype(ew_dtype) + b1_ref[...], 0).astype(matmul_dtype)

        # layer 2: (32,16) @ (16,C)
        a2 = jnp.dot(w2_ref[...], h1, preferred_element_type=jnp.float32)
        h2 = jnp.maximum(a2.astype(ew_dtype) + b2_ref[...], 0).astype(matmul_dtype)

        # output layer: (4,32) @ (32,C), f32 bias add, lane-dense store
        out = jnp.dot(w3_ref[...], h2, preferred_element_type=jnp.float32) + b3_ref[...]
        o_ref[:, pl.ds(start, chunk)] = out.astype(o_ref.dtype)


def mlp_forward(x, params, *, tile_n=4096, matmul_dtype=jnp.bfloat16,
                elementwise_dtype=None, lane_major_output=False):
    """Forward pass equivalent to the PyTorch Model.forward.

    x: (N, 6) float array.  params: (w1,b1,w2,b2,w3,b3) in PyTorch layout
    (W is [out, in], b is [out]).  Returns (N, 4) f32 logits, or (4, N) when
    lane_major_output=True (skips the final HBM transpose pass).
    """
    w1, b1, w2, b2, w3, b3 = params
    n, d_in = x.shape
    d_out = w3.shape[0]
    assert tile_n % 128 == 0 and tile_n >= 128, "tile_n must be a multiple of 128"

    if n == 0:
        shp = (d_out, 0) if lane_major_output else (0, d_out)
        return jnp.zeros(shp, jnp.float32)

    ew_dtype = resolve_elementwise_dtype(matmul_dtype, elementwise_dtype)

    # Batch tile: 128-lane aligned, never larger than the padded batch (tiny
    # N runs as one step).  For >=256 rows, cap so the grid has >=2 steps and
    # the parallel batch axis can shard across both TensorCores on v7x.
    n_lane = _round_up(n, 128)
    tile = min(tile_n, n_lane)
    if n_lane >= 256:
        tile = min(tile, _round_up(-(-n_lane // 2), 128))
    grid = (pl.cdiv(n, tile),)

    # Sub-chunk width for the in-kernel loop (must divide the tile).
    if tile % 512 == 0:
        chunk = 512
    elif tile % 256 == 0:
        chunk = 256
    else:
        chunk = 128

    x32 = x.astype(jnp.float32)                       # no-op for f32 inputs
    w1c, w2c, w3c = (w.astype(matmul_dtype) for w in (w1, w2, w3))
    b1c = b1.reshape(-1, 1).astype(ew_dtype)
    b2c = b2.reshape(-1, 1).astype(ew_dtype)
    b3c = b3.reshape(-1, 1).astype(jnp.float32)

    # Constant index_map -> params DMA'd to VMEM once, never re-fetched.
    const = lambda a: pl.BlockSpec(a.shape, lambda i: (0, 0))

    out_cn = pl.pallas_call(
        functools.partial(mlp_kernel, matmul_dtype=matmul_dtype,
                          ew_dtype=ew_dtype, chunk=chunk),
        out_shape=jax.ShapeDtypeStruct((d_out, n), jnp.float32),
        grid_spec=pltpu.PrefetchScalarGridSpec(
            num_scalar_prefetch=0,
            grid=grid,
            in_specs=[
                pl.BlockSpec((tile, d_in), lambda i: (i, 0)),   # x tile (T, 6)
                const(w1c), const(b1c),
                const(w2c), const(b2c),
                const(w3c), const(b3c),
            ],
            out_specs=pl.BlockSpec((d_out, tile), lambda i: (0, i)),
        ),
        compiler_params=pltpu.CompilerParams(
            # Batch steps are independent -> shards across both TCs on v7x.
            dimension_semantics=("parallel",),
        ),
    )(x32, w1c, b1c, w2c, b2c, w3c, b3c)

    if lane_major_output:
        return out_cn                                  # (4, N), lane-dense
    return out_cn.T                                    # (N, 4), PyTorch layout


def init_params(key):
    """Deterministic PyTorch-style Linear init; W is [out, in], b is [out]."""
    def linear_init(k, fan_in, fan_out):
        k_w, k_b = jax.random.split(k)
        bound = fan_in ** -0.5
        w = jax.random.uniform(k_w, (fan_out, fan_in), jnp.float32, -bound, bound)
        b = jax.random.uniform(k_b, (fan_out,), jnp.float32, -bound, bound)
        return w, b

    k1, k2, k3 = jax.random.split(key, 3)
    w1, b1 = linear_init(k1, 6, 16)
    w2, b2 = linear_init(k2, 16, 32)
    w3, b3 = linear_init(k3, 32, 4)
    return (w1, b1, w2, b2, w3, b3)


def mlp_reference(x, params, matmul_dtype=jnp.float32, elementwise_dtype=None):
    """Plain-JAX reference mirroring the kernel numerics.

    With matmul_dtype=f32 this is exactly the PyTorch forward
    (x @ W.T + b with ReLUs); with bf16 it mirrors the kernel's bf16-operand,
    f32-accumulate matmuls and the generation-gated elementwise dtype.
    """
    md = jnp.dtype(matmul_dtype)
    ew = resolve_elementwise_dtype(md, elementwise_dtype)
    w1, b1, w2, b2, w3, b3 = params
    h = x.astype(jnp.float32).astype(md)
    a1 = jnp.dot(h, w1.astype(md).T, preferred_element_type=jnp.float32)
    h1 = jnp.maximum(a1.astype(ew) + b1.astype(ew), 0).astype(md)
    a2 = jnp.dot(h1, w2.astype(md).T, preferred_element_type=jnp.float32)
    h2 = jnp.maximum(a2.astype(ew) + b2.astype(ew), 0).astype(md)
    return (jnp.dot(h2, w3.astype(md).T, preferred_element_type=jnp.float32)
            + b3.astype(jnp.float32))


# TODO(synk): dataset prep (pandas CSV / one-hot / normalization), the
# BCEWithLogitsLoss + Adam training loop, and the sigmoid/argmax action
# decoder are host-side utilities outside the forward pass and are not
# translated to Pallas.

if __name__ == "__main__":
    key = jax.random.PRNGKey(0)
    k_params, k_small, k_big = jax.random.split(key, 3)
    params = init_params(k_params)

    fwd = jax.jit(mlp_forward,
                  static_argnames=("tile_n", "matmul_dtype",
                                   "elementwise_dtype", "lane_major_output"))

    ew = resolve_elementwise_dtype(jnp.bfloat16)

    # Case 1: tiny batch (the module's typical inference use) -> single
    # 128-lane grid step, no wrapper padding/transpose.  Default bf16 path.
    x_small = jax.random.uniform(k_small, (16, 6), jnp.float32)
    out_small = jax.block_until_ready(fwd(x_small, params, elementwise_dtype=ew))
    assert out_small.shape == (16, 4)
    ref_small = mlp_reference(x_small, params, jnp.bfloat16, ew)
    assert jnp.allclose(out_small, ref_small, atol=5e-3, rtol=5e-3), \
        "small-batch mismatch vs bf16-matched reference"

    # Case 2: ragged larger batch -> 4 parallel grid steps of 512 rows, last
    # block partial (exercises OOB read padding + dropped OOB writes).
    x_big = jax.random.uniform(k_big, (2000, 6), jnp.float32)
    out_big = jax.block_until_ready(
        fwd(x_big, params, tile_n=512, elementwise_dtype=ew))
    assert out_big.shape == (2000, 4)
    ref_big = mlp_reference(x_big, params, jnp.bfloat16, ew)
    assert jnp.allclose(out_big, ref_big, atol=5e-3, rtol=5e-3), \
        "big-batch mismatch vs bf16-matched reference"

    # Case 3: exact PyTorch-semantics path (f32 matmul operands).
    out_f32 = jax.block_until_ready(
        fwd(x_small, params, matmul_dtype=jnp.float32))
    ref_f32 = mlp_reference(x_small, params, jnp.float32)
    assert jnp.allclose(out_f32, ref_f32, atol=1e-4, rtol=1e-4), \
        "f32 path mismatch vs PyTorch-style f32 reference"

    # Case 4: lane-major output path (no final HBM transpose).
    out_cn = jax.block_until_ready(
        fwd(x_small, params, elementwise_dtype=ew, lane_major_output=True))
    assert out_cn.shape == (4, 16)
    assert jnp.allclose(out_cn.T, out_small, atol=1e-6, rtol=1e-6), \
        "lane-major output mismatch vs default layout"

    print("KERNEL_OK")
</pallas_src>

<mosaic_0001>
module attributes {stable_mosaic.version = 11 : i64} {
  func.func @mlp_kernel(%arg0: i32, %arg1: memref<128x6xf32, #tpu.memory_space<vmem>>, %arg2: memref<16x6xbf16, #tpu.memory_space<vmem>>, %arg3: memref<16x1xbf16, #tpu.memory_space<vmem>>, %arg4: memref<32x16xbf16, #tpu.memory_space<vmem>>, %arg5: memref<32x1xbf16, #tpu.memory_space<vmem>>, %arg6: memref<4x32xbf16, #tpu.memory_space<vmem>>, %arg7: memref<4x1xf32, #tpu.memory_space<vmem>>, %arg8: memref<4x128xf32, #tpu.memory_space<vmem>>) attributes {dimension_semantics = [#tpu.dimension_semantics<parallel>], iteration_bounds = array<i64: 1>, scalar_prefetch = 0 : i64, scratch_operands = 0 : i64, tpu.core_type = #tpu.core_type<tc>, window_params = [{transform_indices = @transform_0, window_bounds = array<i64: 128, 6>}, {pipeline_mode = #tpu.pipeline_mode<synchronous>, transform_indices = @transform_1, window_bounds = array<i64: 16, 6>}, {pipeline_mode = #tpu.pipeline_mode<synchronous>, transform_indices = @transform_2, window_bounds = array<i64: 16, 1>}, {pipeline_mode = #tpu.pipeline_mode<synchronous>, transform_indices = @transform_3, window_bounds = array<i64: 32, 16>}, {pipeline_mode = #tpu.pipeline_mode<synchronous>, transform_indices = @transform_4, window_bounds = array<i64: 32, 1>}, {pipeline_mode = #tpu.pipeline_mode<synchronous>, transform_indices = @transform_5, window_bounds = array<i64: 4, 32>}, {pipeline_mode = #tpu.pipeline_mode<synchronous>, transform_indices = @transform_6, window_bounds = array<i64: 4, 1>}, {transform_indices = @transform_7, window_bounds = array<i64: 4, 128>}]} {
    %c0 = arith.constant 0 : index
    %c0_0 = arith.constant 0 : index
    %0 = vector.load %arg1[%c0, %c0_0] : memref<128x6xf32, #tpu.memory_space<vmem>>, vector<128x6xf32>
    %1 = tpu.transpose %0, [1, 0] : vector<128x6xf32> -> vector<6x128xf32>
    %2 = arith.truncf %1 : vector<6x128xf32> to vector<6x128xbf16>
    %c0_1 = arith.constant 0 : index
    %c0_2 = arith.constant 0 : index
    %3 = vector.load %arg2[%c0_1, %c0_2] : memref<16x6xbf16, #tpu.memory_space<vmem>>, vector<16x6xbf16>
    %cst = arith.constant dense<0.000000e+00> : vector<16x128xf32>
    %4 = tpu.matmul %3, %2, %cst {dimension_numbers = #tpu.dot_dimension_numbers<[1], [0], [0], [1], [0, 0, 1, 1], [], []>} : vector<16x6xbf16>, vector<6x128xbf16>, vector<16x128xf32> -> vector<16x128xf32>
    %5 = arith.truncf %4 : vector<16x128xf32> to vector<16x128xbf16>
    %c0_3 = arith.constant 0 : index
    %c0_4 = arith.constant 0 : index
    %6 = vector.load %arg3[%c0_3, %c0_4] : memref<16x1xbf16, #tpu.memory_space<vmem>>, vector<16x1xbf16>
    %7 = vector.broadcast %6 : vector<16x1xbf16> to vector<16x128xbf16>
    %8 = arith.addf %5, %7 : vector<16x128xbf16>
    %cst_5 = arith.constant 0.000000e+00 : bf16
    %9 = vector.broadcast %cst_5 : bf16 to vector<16x128xbf16>
    %10 = arith.maximumf %8, %9 : vector<16x128xbf16>
    %c0_6 = arith.constant 0 : index
    %c0_7 = arith.constant 0 : index
    %11 = vector.load %arg4[%c0_6, %c0_7] : memref<32x16xbf16, #tpu.memory_space<vmem>>, vector<32x16xbf16>
    %cst_8 = arith.constant dense<0.000000e+00> : vector<32x128xf32>
    %12 = tpu.matmul %11, %10, %cst_8 {dimension_numbers = #tpu.dot_dimension_numbers<[1], [0], [0], [1], [0, 0, 1, 1], [], []>} : vector<32x16xbf16>, vector<16x128xbf16>, vector<32x128xf32> -> vector<32x128xf32>
    %13 = arith.truncf %12 : vector<32x128xf32> to vector<32x128xbf16>
    %c0_9 = arith.constant 0 : index
    %c0_10 = arith.constant 0 : index
    %14 = vector.load %arg5[%c0_9, %c0_10] : memref<32x1xbf16, #tpu.memory_space<vmem>>, vector<32x1xbf16>
    %15 = vector.broadcast %14 : vector<32x1xbf16> to vector<32x128xbf16>
    %16 = arith.addf %13, %15 : vector<32x128xbf16>
    %cst_11 = arith.constant 0.000000e+00 : bf16
    %17 = vector.broadcast %cst_11 : bf16 to vector<32x128xbf16>
    %18 = arith.maximumf %16, %17 : vector<32x128xbf16>
    %c0_12 = arith.constant 0 : index
    %c0_13 = arith.constant 0 : index
    %19 = vector.load %arg6[%c0_12, %c0_13] : memref<4x32xbf16, #tpu.memory_space<vmem>>, vector<4x32xbf16>
    %cst_14 = arith.constant dense<0.000000e+00> : vector<4x128xf32>
    %20 = tpu.matmul %19, %18, %cst_14 {dimension_numbers = #tpu.dot_dimension_numbers<[1], [0], [0], [1], [0, 0, 1, 1], [], []>} : vector<4x32xbf16>, vector<32x128xbf16>, vector<4x128xf32> -> vector<4x128xf32>
    %c0_15 = arith.constant 0 : index
    %c0_16 = arith.constant 0 : index
    %21 = vector.load %arg7[%c0_15, %c0_16] : memref<4x1xf32, #tpu.memory_space<vmem>>, vector<4x1xf32>
    %22 = vector.broadcast %21 : vector<4x1xf32> to vector<4x128xf32>
    %23 = arith.addf %20, %22 : vector<4x128xf32>
    %c0_17 = arith.constant 0 : index
    %c0_18 = arith.constant 0 : index
    %24 = vector.load %arg8[%c0_17, %c0_18] : memref<4x128xf32, #tpu.memory_space<vmem>>, vector<4x128xf32>
    tpu.vector_store %arg8[%c0_17, %c0_18], %23 {strides = array<i32>} : memref<4x128xf32, #tpu.memory_space<vmem>>, vector<4x128xf32>,
    return
  }
  func.func @transform_0(%arg0: i32) -> (i32, i32) {
    %c0_i32 = arith.constant 0 : i32
    %c0_i32_0 = arith.constant 0 : i32
    return %arg0, %c0_i32 : i32, i32
  }
  func.func @transform_1(%arg0: i32) -> (i32, i32) {
    %c0_i32 = arith.constant 0 : i32
    %c0_i32_0 = arith.constant 0 : i32
    %c0_i32_1 = arith.constant 0 : i32
    return %c0_i32, %c0_i32_0 : i32, i32
  }
  func.func @transform_2(%arg0: i32) -> (i32, i32) {
    %c0_i32 = arith.constant 0 : i32
    %c0_i32_0 = arith.constant 0 : i32
    %c0_i32_1 = arith.constant 0 : i32
    return %c0_i32, %c0_i32_0 : i32, i32
  }
  func.func @transform_3(%arg0: i32) -> (i32, i32) {
    %c0_i32 = arith.constant 0 : i32
    %c0_i32_0 = arith.constant 0 : i32
    %c0_i32_1 = arith.constant 0 : i32
    return %c0_i32, %c0_i32_0 : i32, i32
  }
  func.func @transform_4(%arg0: i32) -> (i32, i32) {
    %c0_i32 = arith.constant 0 : i32
    %c0_i32_0 = arith.constant 0 : i32
    %c0_i32_1 = arith.constant 0 : i32
    return %c0_i32, %c0_i32_0 : i32, i32
  }
  func.func @transform_5(%arg0: i32) -> (i32, i32) {
    %c0_i32 = arith.constant 0 : i32
    %c0_i32_0 = arith.constant 0 : i32
    %c0_i32_1 = arith.constant 0 : i32
    return %c0_i32, %c0_i32_0 : i32, i32
  }
  func.func @transform_6(%arg0: i32) -> (i32, i32) {
    %c0_i32 = arith.constant 0 : i32
    %c0_i32_0 = arith.constant 0 : i32
    %c0_i32_1 = arith.constant 0 : i32
    return %c0_i32, %c0_i32_0 : i32, i32
  }
  func.func @transform_7(%arg0: i32) -> (i32, i32) {
    %c0_i32 = arith.constant 0 : i32
    %c0_i32_0 = arith.constant 0 : i32
    return %c0_i32, %arg0 : i32, i32
  }
}

</mosaic_0001>

<bundles_post_ra>
// kernel: mlp_forward.1
= control target key start
LH: loop header
LB: loop body
LE: loop exit
PB: predicated region body
PF: predicated region fallthrough
CT: control target
= control target key end

     0   :  { %v446_v2 = vmov 0.0   ;;  %vm447_vm0 = vmmov 0   ;;  %v448_v5 = vmov 0   ;;  %s598_s0 = inlined_call_operand.vmem [shape: f32[16,6], index: 0, kind: input, shape index: {}]   ;;  %s599_s1 = inlined_call_operand.vmem [shape: bf16[16,6], index: 1, kind: input, shape index: {}]   ;;  %s600_s2 = inlined_call_operand.vmem [shape: bf16[16,1], index: 2, kind: input, shape index: {}]   ;;  %s601_s3 = inlined_call_operand.vmem [shape: bf16[32,16], index: 3, kind: input, shape index: {}]   ;;  %s602_s4 = inlined_call_operand.vmem [shape: bf16[32,1], index: 4, kind: input, shape index: {}]   ;;  %s603_s5 = inlined_call_operand.vmem [shape: bf16[4,32], index: 5, kind: input, shape index: {}]   ;;  %s604_s6 = inlined_call_operand.vmem [shape: f32[4,1], index: 6, kind: input, shape index: {}]   ;;  %s605_s7 = inlined_call_operand.hbm [shape: f32[4,16], index: 7, kind: output, shape index: {}]  }
   0x1   :  { %v28_v0 = vld [vmem:[%s598_s0] sm:$0xff]  ;;  %v29_v1 = vld [vmem:[%s598_s0 + $0x8] sm:$0xff]  ;;  %392 = vmatprep.subr.bf16.mxu0 %v446_v2  ;;  %v30_v3 = vld [vmem:[%s598_s0 + $0x10] sm:$0xff]  ;;  %394 = vmatprep.mubr.msk.bf16.mxu0 %vm447_vm0, %v446_v2 }
   0x2   :  { %44 = vxpose.xlu0.b32.start [1/16] (narrow) %v28_v0, 8  ;;  %v134_v4 = vld [vmem:[%s600_s2] sm:$0xf]  ;;  %417 = vset.pattern.permute.xlu1 %v448_v5  ;;  %v31_v6 = vld [vmem:[%s598_s0 + $0x18] sm:$0xff]  ;;  %v135_v7 = vld [vmem:[%s600_s2 + $0x4] sm:$0xf] }
   0x3   :  { %138 = vperm.xlu1 %417, %v134_v4  }
   0x6   :  { %45 = vxpose.xlu0.b32.cont [2/16] (narrow) %v29_v1, 8 }
   0xa   :  { %46 = vxpose.xlu0.b32.cont [3/16] (narrow) %v30_v3, 8 }
   0xb   :  { %12 = vsyncpa [#allocation3], 0  ;;  %v32_v8 = vld [vmem:[%s598_s0 + $0x20] sm:$0xff]  ;;  %150 = vperm.xlu1 %417, %v135_v7   ;;  %v33_v10 = vld [vmem:[%s598_s0 + $0x28] sm:$0xff]  ;;  %vm88_vm1 = vcmask 1042432   ;;  %vm84_vm2 = vcmask 48128   ;;  %v144_v32 = vlaneseq }
   0xc   :  { %v240_v9 = vld [vmem:[%s602_s4] sm:$0xf]  ;;  %v241_v11 = vld [vmem:[%s602_s4 + $0x4] sm:$0xf]  ;;  %v34_v12 = vld [vmem:[%s598_s0 + $0x30] sm:$0xff]  ;;  %vm182_vm3 = vcmask 130048  }
   0xd   :  { %v242_v13 = vld [vmem:[%s602_s4 + $0x8] sm:$0xf]  ;;  %v35_v14 = vld [vmem:[%s598_s0 + $0x38] sm:$0xff]  ;;  %v243_v15 = vld [vmem:[%s602_s4 + $0xc] sm:$0xf]  ;;  %v145_v34 = vshrl.u32 %v144_v32, 7 }
   0xe   :  { %47 = vxpose.xlu0.b32.cont [4/16] (narrow) %v31_v6, 8  ;;  %v36_v16 = vld [vmem:[%s598_s0 + $0x40] sm:$0xff]  ;;  %v37_v18 = vld [vmem:[%s598_s0 + $0x48] sm:$0xff]  ;;  %v38_v19 = vld [vmem:[%s598_s0 + $0x50] sm:$0xff]  ;;  %v449_v30 = vmov 839922192  }
   0xf   :  { %246 = vperm.xlu1 %417, %v240_v9   ;;  %v309_v17 = vld [vmem:[%s604_s6] sm:$0xf]  ;;  %v39_v20 = vld [vmem:[%s598_s0 + $0x58] sm:$0xff]  ;;  %v41_v22 = vld [vmem:[%s598_s0 + $0x68] sm:$0xff]  ;;  %v142_v31 = vunpack.c.l.s4 %v449_v30  ;;  %vm315_vm4 = vcmask 261120   ;;  %s450_s25 = smov [#allocation2]  }
  0x10   :  { %v40_v21 = vld [vmem:[%s598_s0 + $0x60] sm:$0xff]  ;;  %v42_v23 = vld [vmem:[%s598_s0 + $0x70] sm:$0xff]  ;;  %v43_v24 = vld [vmem:[%s598_s0 + $0x78] sm:$0xff]  ;;  %s366_s26 = sshll.u32 %s450_s25, 4  ;;  %s367_s26 = int_to_ptr.vmem [resolvable:$true] %s366_s26 }
  0x11   :  { %v419_v28 = vld [vmem:[%s599_s1] sm:$0xff]   ;;  %v143_v33 = vunpack.c.0.s8 %v142_v31  ;;  %v421_v48 = vld [vmem:[%s601_s3 + $0x8] sm:$0xff]   ;;  %s422_s27 = scalar_lea.vmem %s367_s26, 64  ;;  %p427_p1 = scmp.lt.s32.totalorder %s367_s26, %s367_s26 }
  0x12   :  { %48 = vxpose.xlu0.b32.cont [5/16] (narrow) %v32_v8, 8  ;;  %v420_v29 = vld [vmem:[%s601_s3] sm:$0xff]   ;;  %p423_p0 = scmp.ne.s32.totalorder %s367_s26, %s422_s27  ;;  %p428_p2 = scmp.lt.s32.totalorder %s422_s27, %s422_s27 }
  0x13   :  { %258 = vperm.xlu1 %417, %v241_v11   ;;  %400 = vmatprep.mubr.msk.bf16.mxu1 %vm182_vm3, %v420_v29  ;;  %v146_v36 = vsub.s32 %v143_v33, %v145_v34  ;;  %v308_v7 = vld [vmem:[%s603_s5] sm:$0x3] }
  0x14   :  { %p429_p3 = por %p428_p2, %p427_p1 }
  0x16   :  { %49 = vxpose.xlu0.b32.cont [6/16] (narrow) %v33_v10, 8  ;;  %p430_p4 = pnand %p429_p3, %p423_p0 }
  0x17   :  { %270 = vperm.xlu1 %417, %v242_v13  }
  0x1a   :  { %50 = vxpose.xlu0.b32.cont [7/16] (narrow) %v34_v12, 8 }
  0x1b   :  { %282 = vperm.xlu1 %417, %v243_v15  }
  0x1e   :  { %51 = vxpose.xlu0.b32.cont [8/16] (narrow) %v35_v14, 8 }
  0x1f   :  { %312 = vperm.xlu1 %417, %v309_v17  }
  0x22   :  { %52 = vxpose.xlu0.b32.cont [9/16] (narrow) %v36_v16, 8 }
  0x26   :  { %53 = vxpose.xlu0.b32.cont [10/16] (narrow) %v37_v18, 8 }
  0x2a   :  { %54 = vxpose.xlu0.b32.cont [11/16] (narrow) %v38_v19, 8 }
  0x2e   :  { %55 = vxpose.xlu0.b32.cont [12/16] (narrow) %v39_v20, 8 }
  0x32   :  { %56 = vxpose.xlu0.b32.cont [13/16] (narrow) %v40_v21, 8 }
  0x36   :  { %57 = vxpose.xlu0.b32.cont [14/16] (narrow) %v41_v22, 8 }
  0x3a   :  { %58 = vxpose.xlu0.b32.cont [15/16] (narrow) %v42_v23, 8 }
  0x3e   :  { %59 = vxpose.xlu0.b32.end [16/16] (narrow) %v43_v24, 8 }
  0x67   :  { %418 = vset.pattern.permute.xlu0 %v448_v5 }
  0x82   :  { %v60_v25 = vpop.trf.xlu0  ;;  %v139_v35 = vpop.permute.xlu1 %138 }
  0x83   :  { %v76_v26 = vpack.c.bf16 %v60_v25, %v60_v25  ;;  %v147_v38 = vrot.slane %v139_v35, %v146_v36 }
  0x85   :  { %v90_v27 = vsel %vm88_vm1, %v76_v26, 0 }
  0x86   :  { %393 = vmatpush3.bf16.msra.mxu0 %v90_v27 }
  0x87   :  { %404 = vmatprep.subr.bf16.mxu0 %v446_v2 }
  0x89   :  { %395 = vmatmul.mubr.msk.bf16.vlgmr.msra.gmra.mrb[0].mxu0 %vm84_vm2, %v419_v28 }
  0x8a   :  { %408 = vmatprep.mubr.msk.bf16.mxu0 %vm447_vm0, %v446_v2  ;;  %v151_v37 = vpop.permute.xlu1 %150 }
  0x8b   :  { %v159_v39 = vrot.slane %v151_v37, %v146_v36 }
  0x8d   :  { %v376_v43 = vcombine.low %v147_v38, %v159_v39 }
  0x8e   :  { %v247_v49 = vpop.permute.xlu1 %246 }
  0x8f   :  { %v255_v55 = vrot.slane %v247_v49, %v146_v36 }
  0x92   :  { %v259_v50 = vpop.permute.xlu1 %258 }
  0x93   :  { %v267_v56 = vrot.slane %v259_v50, %v146_v36 }
  0x95   :  { %v381_v63 = vcombine.low %v255_v55, %v267_v56 }
  0x96   :  { %v271_v51 = vpop.permute.xlu1 %270 }
  0x97   :  { %v279_v53 = vrot.slane %v271_v51, %v146_v36 }
  0x9a   :  { %v283_v52 = vpop.permute.xlu1 %282 }
  0x9b   :  { %v291_v54 = vrot.slane %v283_v52, %v146_v36 }
  0x9d   :  { %v382_v60 = vcombine.low %v279_v53, %v291_v54 }
  0x9e   :  { %v313_v8 = vpop.permute.xlu1 %312 }
 0x15c   :  { %v126_v40 = vpop.f32.mrb[0].mxu0 }
 0x15d   :  { %v396_v41 = vpop.f32.mrb[1].mxu0 }
 0x15e   :  { %v129_v42 = vpop.f32.mrb[2].mxu0 }
 0x15f   :  { %v133_v44 = vpack.c.bf16 %v129_v42, %v126_v40  ;;  %v397_v45 = vpop.f32.mrb[3].mxu0 }
 0x161   :  { %v166_v46 = vadd.bf16 %v376_v43, %v133_v44 }
 0x163   :  { %v167_v47 = vmax.bf16 %v448_v5, %v166_v46 }
 0x165   :  { %398 = vmatprep.subr.bf16.mxu1 %v167_v47 }
 0x166   :  { %399 = vmatpush3.bf16.msra.mxu1 %v167_v47 }
 0x169   :  { %401 = vmatmul.mubr.msk.bf16.vlgmr.msra.gmra.mrb[0].mxu1 %vm182_vm3, %v421_v48 }
 0x23c   :  { %v402_v57 = vpop.f32.mrb[0].mxu1 }
 0x23d   :  { %v223_v58 = vpop.f32.mrb[1].mxu1 }
 0x23e   :  { %v403_v59 = vpop.f32.mrb[2].mxu1 }
 0x23f   :  { %v239_v61 = vpack.c.bf16 %v403_v59, %v402_v57  ;;  %v226_v62 = vpop.f32.mrb[3].mxu1 }
 0x240   :  { %v238_v0 = vpack.c.bf16 %v226_v62, %v223_v58 }
 0x241   :  { %v305_v1 = vadd.bf16 %v382_v60, %v239_v61 }
 0x242   :  { %v304_v3 = vadd.bf16 %v381_v63, %v238_v0 }
 0x243   :  { %v307_v6 = vmax.bf16 %v448_v5, %v305_v1 }
 0x244   :  { %v306_v4 = vmax.bf16 %v448_v5, %v304_v3 }
 0x246   :  { %405 = vmatpush3.bf16.msra.mxu0 %v306_v4 }
 0x247   :  { %406 = vmatprep.subr.bf16.mxu0 %v446_v2 }
 0x24a   :  { %407 = vmatpush3.bf16.msra.mxu0 %v307_v6 }
 0x24d   :  { %409 = vmatmul.mubr.msk.bf16.vlgmr.msra.gmra.mrb[4].mxu0 %vm315_vm4, %v308_v7 }
 0x320   :  { %v353_v9 = vpop.f32.mrb[4].mxu0 }
 0x321   :  { %v354_v10 = vadd.f32 %v353_v9, %v313_v8  ;;  %v410_v11 = vpop.f32.mrb[5].mxu0 }
 0x322   :  { %v356_v12 = vpop.f32.mrb[6].mxu0 }
 0x323   :  { %359 = vst [vmem:[#allocation2] sm:$0xf] %v354_v10  ;;  %v411_v13 = vpop.f32.mrb[7].mxu0 }
 0x324   :  { %433 = shalt.err (!%p430_p4)
}
 0x325   :  { %s434_s29 = scalar_lea.hbm %s605_s7, 64 }
 0x326   :  { %p435_p5 = scmp.ne.s32.totalorder %s605_s7, %s434_s29  ;;  %p438_p6 = scmp.lt.u32.totalorder %s434_s29, %s605_s7 }
 0x328   :  { %p440_p7 = pnand %p438_p6, %p435_p5 }
 0x32a   :  { %443 = shalt.err (!%p440_p7)
}
 0x32b   :  { %369 = dma.vmem_to_hbm [thread:$0]  %s367_s26, 64, %s605_s7, [#allocation3]  }
 0x32c   :  { %444 = dma.done.wait [#allocation3], 64  }
 0x32d   :  { %445 = vsyncadd [#allocation3], 4294967232 }
 0x32e   :  { %373 = vsyncpa [#allocation3], 1 }

</bundles_post_ra>
